<compile_context>
chip_gen: v7x
topology: tpu7x:2x2x1
jax: 0.10.0
libtpu: 0.0.40
codegen_flags: <defaults>
</compile_context>

<pallas_src>
import math

import jax
import jax.numpy as jnp
from jax.experimental import pallas as pl
from jax.experimental.pallas import tpu as pltpu


def _round_up(x, m):
    return (x + m - 1) // m * m


# --------------------------------------------------------------------------
# Kernels
# --------------------------------------------------------------------------
def _linear_kernel_single_k(x_ref, w_ref, b_ref, o_ref):
    # x_ref: (tm, K)  w_ref: (K, tn)  b_ref: (1, tn)  o_ref: (tm, tn)
    acc = jnp.dot(x_ref[...], w_ref[...], preferred_element_type=jnp.float32)
    o_ref[...] = (acc + b_ref[...].astype(jnp.float32)).astype(o_ref.dtype)


def _linear_kernel_multi_k(x_ref, w_ref, b_ref, o_ref, acc_ref):
    # x_ref: (tm, tk)  w_ref: (tk, tn)  b_ref: (1, tn)
    # o_ref: (tm, tn)  acc_ref: (tm, tn) f32 scratch
    k = pl.program_id(2)
    partial = jnp.dot(x_ref[...], w_ref[...], preferred_element_type=jnp.float32)

    @pl.when(k == 0)
    def _():
        acc_ref[...] = partial            # first K block: write, don't zero+add

    @pl.when(k != 0)
    def _():
        acc_ref[...] += partial

    @pl.when(k == pl.num_programs(2) - 1)
    def _():
        o_ref[...] = (acc_ref[...] + b_ref[...].astype(jnp.float32)).astype(o_ref.dtype)


# --------------------------------------------------------------------------
# Parameter preparation (one-time, outside the hot path)
# --------------------------------------------------------------------------
def prepare_linear_norm_params(weight, bias=None, compute_dtype=jnp.bfloat16):
    """Transpose weight to (in_dim, out_dim) and cast to the MXU compute dtype.

    Weight is a static parameter, so this one-time transpose/cast is amortized
    across calls; the kernel then runs a standard (tm,tk)x(tk,tn) contraction.
    """
    out_dim, in_dim = weight.shape
    w_kn = jnp.asarray(weight.T, dtype=compute_dtype)          # (K, N)
    if bias is None:
        bias = jnp.zeros((out_dim,), jnp.float32)
    b2d = jnp.asarray(bias, jnp.float32).reshape(1, out_dim)   # (1, N), f32
    return w_kn, b2d


# --------------------------------------------------------------------------
# Hot path
# --------------------------------------------------------------------------
def linear_norm_apply(x, w_kn, b2d, *, tm=512, tn=512, tk_max=2048):
    """y = x @ w_kn + b; w_kn: (in_dim, out_dim) already in compute dtype."""
    K, N = w_kn.shape
    orig_shape = x.shape
    assert orig_shape[-1] == K
    out_dtype = x.dtype
    compute_dtype = w_kn.dtype

    x2d = x.reshape(-1, K)
    if x2d.dtype != compute_dtype:
        x2d = x2d.astype(compute_dtype)    # bf16 halves DMA bytes per x tile
    M = x2d.shape[0]

    # ---- tile selection: (8,128)-aligned, MXU-width friendly ---------------
    tm = min(tm, _round_up(M, 8))
    tn = min(tn, _round_up(N, 128))

    # v7x has 2 TensorCores: make sure the parallel grid has >= 2 tiles.
    if pl.cdiv(M, tm) * pl.cdiv(N, tn) < 2:
        if M > 8:
            tm = _round_up(pl.cdiv(M, 2), 8)
        elif N > 128:
            tn = 128 * pl.cdiv(pl.cdiv(N, 128), 2)

    if K <= tk_max:
        tk = K                                   # full-extent K block, no pad
    else:
        tk = min(512, _round_up(tk_max, 128))    # tiled K, multiple of 128/256

    # K padding is load-bearing (garbage in the K edge block would corrupt all
    # valid outputs).  M/N edges are left to Pallas' masked edge loads/stores.
    Kp = _round_up(K, tk)
    if Kp != K:
        x2d = jnp.pad(x2d, ((0, 0), (0, Kp - K)))
        w_kn = jnp.pad(w_kn, ((0, Kp - K), (0, 0)))
    n_k = Kp // tk
    n_m, n_n = pl.cdiv(M, tm), pl.cdiv(N, tn)

    # Stream the larger operand once: its grid axis goes outermost.
    m_outer = M >= N

    if n_k == 1:
        kernel = _linear_kernel_single_k
        scratch = []
        dims = ("parallel", "parallel")
        if m_outer:
            grid = (n_m, n_n)
            x_map = lambda i, j: (i, 0)
            w_map = lambda i, j: (0, j)
            b_map = lambda i, j: (0, j)
            o_map = lambda i, j: (i, j)
        else:
            grid = (n_n, n_m)
            x_map = lambda j, i: (i, 0)
            w_map = lambda j, i: (0, j)
            b_map = lambda j, i: (0, j)
            o_map = lambda j, i: (i, j)
    else:
        kernel = _linear_kernel_multi_k
        scratch = [pltpu.VMEM((tm, tn), jnp.float32)]
        dims = ("parallel", "parallel", "arbitrary")   # K reduction innermost
        if m_outer:
            grid = (n_m, n_n, n_k)
            x_map = lambda i, j, k: (i, k)
            w_map = lambda i, j, k: (k, j)
            b_map = lambda i, j, k: (0, j)
            o_map = lambda i, j, k: (i, j)
        else:
            grid = (n_n, n_m, n_k)
            x_map = lambda j, i, k: (i, k)
            w_map = lambda j, i, k: (k, j)
            b_map = lambda j, i, k: (0, j)
            o_map = lambda j, i, k: (i, j)

    # ---- VMEM budget (double-buffered tiles + accumulator) + headroom ------
    cbytes = jnp.dtype(compute_dtype).itemsize
    obytes = jnp.dtype(out_dtype).itemsize
    footprint = (2 * (tm * tk * cbytes + tk * tn * cbytes + tm * tn * obytes)
                 + (tm * tn * 4 if n_k > 1 else 0) + 2 * tn * 4)
    vmem_limit = int(min(max(footprint + (16 << 20), 32 << 20), 64 << 20))

    # Advisory cost hint (accounts for re-reads of the re-streamed operand).
    if m_outer:
        bytes_accessed = (M * Kp * cbytes + n_m * Kp * N * cbytes
                          + M * N * obytes + N * 4)
    else:
        bytes_accessed = (n_n * M * Kp * cbytes + Kp * N * cbytes
                          + M * N * obytes + N * 4)
    cost = pl.CostEstimate(flops=2 * M * K * N, transcendentals=0,
                           bytes_accessed=bytes_accessed)

    out = pl.pallas_call(
        kernel,
        out_shape=jax.ShapeDtypeStruct((M, N), out_dtype),
        grid=grid,
        in_specs=[
            pl.BlockSpec((tm, tk), x_map),   # x       (M, Kp)
            pl.BlockSpec((tk, tn), w_map),   # weight  (Kp, N)
            pl.BlockSpec((1, tn), b_map),    # bias    (1, N)
        ],
        out_specs=pl.BlockSpec((tm, tn), o_map),
        scratch_shapes=scratch,
        compiler_params=pltpu.CompilerParams(
            dimension_semantics=dims,
            vmem_limit_bytes=vmem_limit),
        cost_estimate=cost,
    )(x2d, w_kn, b2d)

    return out.reshape(*orig_shape[:-1], N)


def linear_norm_forward(x, weight, bias=None, *, compute_dtype=jnp.bfloat16,
                        tm=512, tn=512, tk_max=2048):
    """Convenience wrapper: y = x @ weight.T + bias, weight: (out_dim, in_dim).

    For repeated calls, do the prepare step once and call linear_norm_apply.
    """
    w_kn, b2d = prepare_linear_norm_params(weight, bias, compute_dtype)
    return linear_norm_apply(x, w_kn, b2d, tm=tm, tn=tn, tk_max=tk_max)


# --------------------------------------------------------------------------
# Parameter init mirroring the PyTorch module
# --------------------------------------------------------------------------
def init_linear_norm_params(key, in_dim, out_dim, w_init_gain="linear"):
    gain = 1.0  # calculate_gain('linear') == 1.0
    k_w, k_b = jax.random.split(key)
    # xavier_uniform_: U(-a, a), a = gain * sqrt(6 / (fan_in + fan_out))
    a = gain * math.sqrt(6.0 / (in_dim + out_dim))
    weight = jax.random.uniform(k_w, (out_dim, in_dim), jnp.float32, -a, a)
    # nn.Linear default bias init: U(-1/sqrt(fan_in), 1/sqrt(fan_in))
    bound = 1.0 / math.sqrt(in_dim)
    bias = jax.random.uniform(k_b, (out_dim,), jnp.float32, -bound, bound)
    return weight, bias


if __name__ == "__main__":
    key = jax.random.PRNGKey(0)
    k_params, k_x = jax.random.split(key)

    batch, seq, in_dim, out_dim = 2, 8, 32, 64
    weight, bias = init_linear_norm_params(k_params, in_dim, out_dim)
    x = jax.random.normal(k_x, (batch, seq, in_dim), jnp.float32)
    y_ref = x @ weight.T + bias

    # Default path: bf16 MXU operands, f32 accumulation, single K block.
    y = jax.block_until_ready(linear_norm_forward(x, weight, bias))
    assert y.shape == (batch, seq, out_dim)
    assert y.dtype == x.dtype
    assert jnp.allclose(y, y_ref, atol=3e-2, rtol=3e-2)

    # Exact-dtype (f32) compute path.
    y32 = jax.block_until_ready(
        linear_norm_forward(x, weight, bias, compute_dtype=jnp.float32))
    assert jnp.allclose(y32, y_ref, atol=2e-2, rtol=2e-2)

    # Exercise the tiled-K (multi-block reduction) kernel.
    in_dim2 = 384
    w2, b2 = init_linear_norm_params(k_params, in_dim2, out_dim)
    x2 = jax.random.normal(k_x, (batch, seq, in_dim2), jnp.float32)
    y2 = jax.block_until_ready(linear_norm_forward(x2, w2, b2, tk_max=128))
    y2_ref = x2 @ w2.T + b2
    assert jnp.allclose(y2, y2_ref, atol=3e-2, rtol=3e-2)

    print("KERNEL_OK")
</pallas_src>

<mosaic_0001>
module attributes {stable_mosaic.version = 11 : i64} {
  func.func @_linear_kernel_single_k(%arg0: i32, %arg1: i32, %arg2: memref<8x32xbf16, #tpu.memory_space<vmem>>, %arg3: memref<32x128xbf16, #tpu.memory_space<vmem>>, %arg4: memref<1x128xf32, #tpu.memory_space<vmem>>, %arg5: memref<8x128xf32, #tpu.memory_space<vmem>>) attributes {dimension_semantics = [#tpu.dimension_semantics<parallel>, #tpu.dimension_semantics<parallel>], iteration_bounds = array<i64: 1, 2>, scalar_prefetch = 0 : i64, scratch_operands = 0 : i64, tpu.core_type = #tpu.core_type<tc>, window_params = [{transform_indices = @transform_0, window_bounds = array<i64: 8, 32>}, {transform_indices = @transform_1, window_bounds = array<i64: 32, 128>}, {transform_indices = @transform_2, window_bounds = array<i64: 1, 128>}, {transform_indices = @transform_3, window_bounds = array<i64: 8, 128>}]} {
    %c0 = arith.constant 0 : index
    %c0_0 = arith.constant 0 : index
    %0 = vector.load %arg2[%c0, %c0_0] : memref<8x32xbf16, #tpu.memory_space<vmem>>, vector<8x32xbf16>
    %c0_1 = arith.constant 0 : index
    %c0_2 = arith.constant 0 : index
    %1 = vector.load %arg3[%c0_1, %c0_2] : memref<32x128xbf16, #tpu.memory_space<vmem>>, vector<32x128xbf16>
    %cst = arith.constant dense<0.000000e+00> : vector<8x128xf32>
    %2 = tpu.matmul %0, %1, %cst {dimension_numbers = #tpu.dot_dimension_numbers<[1], [0], [0], [1], [0, 0, 1, 1], [], []>} : vector<8x32xbf16>, vector<32x128xbf16>, vector<8x128xf32> -> vector<8x128xf32>
    %c0_3 = arith.constant 0 : index
    %c0_4 = arith.constant 0 : index
    %3 = vector.load %arg4[%c0_3, %c0_4] : memref<1x128xf32, #tpu.memory_space<vmem>>, vector<1x128xf32>
    %4 = vector.broadcast %3 : vector<1x128xf32> to vector<8x128xf32>
    %5 = arith.addf %2, %4 : vector<8x128xf32>
    %c0_5 = arith.constant 0 : index
    %c0_6 = arith.constant 0 : index
    %6 = vector.load %arg5[%c0_5, %c0_6] : memref<8x128xf32, #tpu.memory_space<vmem>>, vector<8x128xf32>
    tpu.vector_store %arg5[%c0_5, %c0_6], %5 {strides = array<i32>} : memref<8x128xf32, #tpu.memory_space<vmem>>, vector<8x128xf32>,
    return
  }
  func.func @transform_0(%arg0: i32, %arg1: i32) -> (i32, i32) {
    %c0_i32 = arith.constant 0 : i32
    %c0_i32_0 = arith.constant 0 : i32
    return %arg1, %c0_i32 : i32, i32
  }
  func.func @transform_1(%arg0: i32, %arg1: i32) -> (i32, i32) {
    %c0_i32 = arith.constant 0 : i32
    %c0_i32_0 = arith.constant 0 : i32
    return %c0_i32, %arg0 : i32, i32
  }
  func.func @transform_2(%arg0: i32, %arg1: i32) -> (i32, i32) {
    %c0_i32 = arith.constant 0 : i32
    %c0_i32_0 = arith.constant 0 : i32
    return %c0_i32, %arg0 : i32, i32
  }
  func.func @transform_3(%arg0: i32, %arg1: i32) -> (i32, i32) {
    %c0_i32 = arith.constant 0 : i32
    return %arg1, %arg0 : i32, i32
  }
}

</mosaic_0001>

<bundles_post_ra>
// kernel: tpu_custom_call.1
= control target key start
LH: loop header
LB: loop body
LE: loop exit
PB: predicated region body
PF: predicated region fallthrough
CT: control target
= control target key end

     0   :  { %8 = vsyncpa [#allocation3], 0  ;;  %s925_s0 = inlined_call_operand.hbm [shape: bf16[16,32], index: 0, kind: input, shape index: {}]   ;;  %s926_s1 = inlined_call_operand.hbm [shape: bf16[32,64], index: 1, kind: input, shape index: {}]   ;;  %s927_s2 = inlined_call_operand.vmem [shape: f32[1,64], index: 2, kind: input, shape index: {}]   ;;  %s928_s3 = inlined_call_operand.hbm [shape: f32[16,64], index: 3, kind: output, shape index: {}]  }
   0x1   :  { %10 = vsyncpa [#allocation3 + $0x1], 0 }
   0x2   :  { %11 = vsyncpa [#allocation6], 0 }
   0x3   :  { %12 = vsyncpa [#allocation4], 0 }
   0x4   :  { %14 = vsyncpa [#allocation4 + $0x1], 0  ;;  %s707_s12 = smov 0   ;;  %s709_s13 = smov 0  }
   0x5   :  { %s711_s14 = smov 0   ;;  %s713_s15 = smov 0  }
   0x6   :  { %s715_s16 = smov 0   ;;  %s717_s17 = smov 0  }
   0x7 LB: > { %s424_s18 = sadd.s32 4294967295, %s678_s17   ;;  %s425_s19 = sadd.s32 4294967294, %s678_s17   ;;  %s678_s17 = sphi %s717_s17, %s20_s17   ;;  %s674_s16 = sphi %s715_s16, %s952_s16   ;;  %s670_s15 = sphi %s713_s15, %s951_s15   ;;  %s666_s14 = sphi %s711_s14, %s950_s14   ;;  %s662_s13 = sphi %s709_s13, %s949_s13   ;;  %s658_s12 = sphi %s707_s12, %s948_s12  }
   0x8   : > { %p52_p0 = scmp.ne.s32.totalorder %s662_s13, %s658_s12  ;;  %p741_p1 = scmp.eq.s32.totalorder %s424_s18, 0 }
   0x9   : > { %p745_p2 = scmp.eq.s32.totalorder %s424_s18, 1  ;;  %p136_p3 = scmp.eq.s32.totalorder %s425_s19, 1 }
   0xa   : > { %s933_s20 = scalar_select %p741_p1, 1, 0 }
   0xb   : > { %s934_s21 = scalar_select %p745_p2, 1, 0 }
   0xc   : > { %p751_p4 = por %p741_p1, %p52_p0  ;;  %p426_p5 = scmp.ge.s32.totalorder %s678_s17, 1 }
   0xd   : > { %p756_p6 = por %p136_p3, %p52_p0  ;;  %p143_p7 = scmp.lt.s32.totalorder %s678_s17, 3 }
   0xe   : > { %s935_s22 = scalar_select %p751_p4, 1, 0 }
   0xf   : > { %s936_s23 = scalar_select %p756_p6, 1, 0 }
  0x10   : > { %p761_p8 = pnand %p426_p5, %p143_p7  ;;  %s680_s25 = smov [#allocation5]  }
  0x11   : > { %s157_s26 = sshll.u32 %s680_s25, 4  ;;  %s29_s28 = sadd.s32 1, %s674_s16  ;;  %s158_s26 = int_to_ptr.vmem [resolvable:$true] %s157_s26 }
  0x12   : > { %s937_s24 = scalar_select %p761_p8, 1, 0 }
  0x13   : > { %p463_p9 = pneg %p761_p8  ;;  %s534_s4 = scalar_lea.hbm %s926_s1, 256 }
  0x14   : > { %p535_p12 = scmp.ne.s32.totalorder %s926_s1, %s534_s4  ;;  %p541_p5 = scmp.lt.u32.totalorder %s534_s4, %s926_s1 }
  0x15   : > { %p770_p11 = pnand %p463_p9, %p741_p1 }
  0x17   : > { %p536_p13 = pneg %p770_p11 }
  0x19   : > { %p537_p0 = pnand %p536_p13, %p535_p12 }
  0x1b   : > { %p538_p3 = pneg %p537_p0 }
  0x1d   : > { %p543_p7 = pnand %p541_p5, %p538_p3 }
  0x1f   : > { %546 = shalt.err (!%p543_p7)
}
  0x20   : > { %s547_s9 = scalar_lea.vmem %s158_s26, 256  ;;  %p555_p1 = scmp.lt.s32.totalorder %s158_s26, %s158_s26 }
  0x21   : > { %p548_p9 = scmp.ne.s32.totalorder %s158_s26, %s547_s9  ;;  %p556_p4 = scmp.lt.s32.totalorder %s547_s9, %s547_s9 }
  0x23   : > { %p550_p10 = pnand %p548_p9, %p536_p13  ;;  %p557_p8 = por %p556_p4, %p555_p1 }
  0x25   : > { %p551_p6 = pneg %p550_p10 }
  0x27   : > { %p558_p2 = pnand %p557_p8, %p551_p6 }
  0x29   : > { %561 = shalt.err (!%p558_p2)
}
  0x2a   : > { %s681_s10 = smov 64   ;;  %s682_s11 = smov 4  }
  0x2b   : > { %466 = dma.hbm_to_vmem [thread:$0]  (!%p770_p11), %s926_s1, 256, %s158_s26, [#allocation6], %s681_s10, %s681_s10, %s682_s11  }
  0x2c   : > { %p30_p1 = scmp.ge.s32.totalorder %s29_s28, 2  ;;  %s39_s25 = sadd.s32 1, %s666_s14 }
  0x2d   : > { %p46_p2 = scmp.ne.s32.totalorder %s666_s14, %s662_s13  ;;  %p47_p4 = scmp.eq.s32.totalorder %s678_s17, 0 }
  0x2e   : > { %s954_s28 = smov (%p30_p1, %s29_s28), 0  ;;  %p940_p8 = scmp.ne.s32.totalorder %s934_s21, 0 }
  0x2f   : > { %p797_p6 = por %p47_p4, %p46_p2  ;;  %s36_s27 = ssub.s32 %s674_s16, %s954_s28 }
  0x30   : > { %p803_p10 = por %p940_p8, %p46_p2  ;;  %p476_p12 = scmp.lt.s32.totalorder %s678_s17, 2 }
  0x31   : > { %p37_p11 = scmp.eq.s32.totalorder %s36_s27, 0  ;;  %s177_s26 = sand.u32 1, %s666_s14  }
  0x32   : > { %s430_s4 = sshll.u32 %s177_s26, 2  ;;  %s431_s6 = sshll.u32 %s674_s16, 6 }
  0x33   : > { %s812_s5 = scalar_select %p37_p11, %s666_s14, %s39_s25  }
  0x34   : > { %s818_s9 = scalar_lea.hbm %s925_s0, %s431_s6  ;;  %s181_s21 = scalar_lea.vmem [#allocation2], %s430_s4 }
  0x35   : > { %s188_s10 = sshll.u32 %s181_s21, 4  ;;  %p824_p13 = pnand %p476_p12, %p797_p6  ;;  %s820_s10 = int_to_ptr.vmem [resolvable:$true] %s188_s10 }
  0x36   : > { %s178_s18 = scalar_lea.sflag [#allocation3], %s177_s26  ;;  %s562_s19 = scalar_lea.hbm %s818_s9, 64 }
  0x37   : > { %p563_p0 = scmp.ne.s32.totalorder %s818_s9, %s562_s19  ;;  %p564_p3 = pneg %p824_p13 }
  0x38   : > { %s567_s4 = scalar_lea.hbm %s925_s0, 128  ;;  %p568_p9 = scmp.lt.u32.totalorder %s818_s9, %s925_s0 }
  0x39   : > { %p565_p5 = pnand %p564_p3, %p563_p0  ;;  %p569_p1 = scmp.lt.u32.totalorder %s567_s4, %s562_s19 }
  0x3a   : > { %p571_p4 = scmp.lt.u32.totalorder %s562_s19, %s818_s9 }
  0x3b   : > { %p566_p7 = pneg %p565_p5  ;;  %p570_p2 = por %p569_p1, %p568_p9 }
  0x3d   : > { %p572_p6 = por %p571_p4, %p570_p2 }
  0x3f   : > { %p573_p8 = pnand %p572_p6, %p566_p7 }
  0x41   : > { %576 = shalt.err (!%p573_p8)
}
  0x42   : > { %s577_s26 = scalar_lea.vmem %s820_s10, 64  ;;  %s683_s7 = smov [#allocation2]  }
  0x43   : > { %p578_p12 = scmp.ne.s32.totalorder %s820_s10, %s577_s26  ;;  %s582_s8 = sshll.u32 %s683_s7, 4  ;;  %s583_s8 = int_to_ptr.vmem [resolvable:$false] %s582_s8 }
  0x44   : > { %s584_s21 = scalar_lea.vmem %s583_s8, 128  ;;  %p585_p5 = scmp.lt.s32.totalorder %s820_s10, %s583_s8 }
  0x45   : > { %p580_p11 = pnand %p578_p12, %p564_p3  ;;  %p586_p9 = scmp.lt.s32.totalorder %s584_s21, %s577_s26 }
  0x47   : > { %p581_p0 = pneg %p580_p11  ;;  %p587_p1 = por %p586_p9, %p585_p5 }
  0x49   : > { %p588_p2 = pnand %p587_p1, %p581_p0 }
  0x4b   : > { %591 = shalt.err (!%p588_p2)
}
  0x4c   : > { %470 = dma.hbm_to_vmem [thread:$0]  (!%p824_p13), %s818_s9, 64, %s820_s10, %s178_s18  }
  0x4d   : > { %p943_p7 = scmp.ne.s32.totalorder %s937_s24, 0 }
  0x4e   : > { %s856_s19 = sand.u32 (!%p943_p7), 1, %s662_s13   ;;  %p944_p3 = scmp.ne.s32.totalorder (!%p943_p7), %s935_s22, 0 }
  0x4f   : > { %197 = sbr.rel (%p943_p7) target bundleno = 327 (0x147), region = 32  ;;  %s433_s25 = sshll.u32 (!%p943_p7), %s856_s19, 2 }
  0x50   : > { %s200_s27 = scalar_lea.sflag (!%p943_p7), [#allocation3], %s856_s19  ;;  %s203_s4 = scalar_lea.vmem (!%p943_p7), [#allocation2], %s433_s25 }
  0x56   : > { %645 = dma.done.wait (%p944_p3), %s200_s27, 64  }
  0x57   : > { %647 = vsyncadd (%p944_p3), %s200_s27, 4294967232  ;;  %p945_p4 = scmp.ne.s32.totalorder %s933_s20, 0 }
  0x59   : > { %649 = dma.done.wait (%p945_p4), [#allocation6], 256  }
  0x5a   : > { %651 = vsyncadd (%p945_p4), [#allocation6], 4294967040  ;;  %v684_v0 = vmov 0.0   ;;  %vm685_vm0 = vmmov 0   ;;  %v532_v1 = vld [vmem:[#allocation5] sm:$0xff]   ;;  %v533_v2 = vld [vmem:[#allocation5 + $0x8] sm:$0xff]  }
  0x5b   : > { %447 = vmatprep.subr.bf16.mxu0 %v684_v0  ;;  %451 = vmatprep.mubr.msk.bf16.mxu0 %vm685_vm0, %v684_v0  ;;  %v237_v3 = vld [vmem:[%s203_s4] sm:$0xf]  ;;  %vm261_vm1 = vcmask 261120   ;;  %s435_s22 = sshll.u32 %s856_s19, 3  ;;  %s441_s20 = sshll.u32 %s670_s15, 7 }
  0x5c   : > { %448 = vmatpush3.bf16.msra.mxu0 %v532_v1  ;;  %v436_v4 = vld [vmem:[%s927_s2] ss:$0 sm:$0xff]  ;;  %s232_s10 = scalar_lea.vmem [#allocation7], %s435_s22  ;;  %s876_s6 = scalar_lea.hbm %s928_s3, %s441_s20 }
  0x5d   : > { %449 = vmatprep.subr.bf16.mxu0 %v684_v0  ;;  %s321_s11 = sshll.u32 %s232_s10, 4  ;;  %s307_s26 = scalar_lea.sflag [#allocation4], %s856_s19  ;;  %s878_s11 = int_to_ptr.vmem [resolvable:$true] %s321_s11 }
  0x5e   : > { %s592_s15 = scalar_lea.vmem %s878_s11, 128  ;;  %s686_s7 = smov [#allocation7]  }
  0x5f   : > { %p593_p13 = scmp.ne.s32.totalorder %s878_s11, %s592_s15  ;;  %s596_s8 = sshll.u32 %s686_s7, 4  ;;  %s597_s8 = int_to_ptr.vmem [resolvable:$false] %s596_s8 }
  0x60   : > { %450 = vmatpush3.bf16.msra.mxu0 %v533_v2  ;;  %s598_s21 = scalar_lea.vmem %s597_s8, 256  ;;  %p599_p12 = scmp.lt.s32.totalorder %s878_s11, %s597_s8 }
  0x61   : > { %p594_p6 = pnand %p593_p13, %p803_p10  ;;  %p600_p11 = scmp.lt.s32.totalorder %s598_s21, %s592_s15 }
  0x63   : > { %452 = vmatmul.mubr.msk.bf16.vlgmr.msra.gmra.mrb[0].mxu0 %vm261_vm1, %v237_v3  ;;  %p595_p8 = pneg %p594_p6  ;;  %p601_p0 = por %p600_p11, %p599_p12 }
  0x65   : > { %p602_p5 = pnand %p601_p0, %p595_p8 }
 0x136   : > { %v299_v5 = vpop.f32.mrb[0].mxu0 }
 0x137   : > { %v300_v6 = vadd.f32 %v436_v4, %v299_v5  ;;  %v453_v7 = vpop.f32.mrb[1].mxu0 }
 0x138   : > { %v302_v8 = vpop.f32.mrb[2].mxu0 }
 0x139   : > { %305 = vst [vmem:[%s232_s10] sm:$0xff] %v300_v6  ;;  %v454_v9 = vpop.f32.mrb[3].mxu0 }
 0x13a   : > { %605 = shalt.err (!%p602_p5)
}
 0x13b   : > { %s606_s19 = scalar_lea.hbm %s876_s6, 128  ;;  %s610_s4 = scalar_lea.hbm %s928_s3, 256 }
 0x13c   : > { %p607_p9 = scmp.ne.s32.totalorder %s876_s6, %s606_s19  ;;  %p611_p7 = scmp.lt.u32.totalorder %s876_s6, %s928_s3 }
 0x13d   : > { %p612_p3 = scmp.lt.u32.totalorder %s610_s4, %s606_s19  ;;  %p614_p13 = scmp.lt.u32.totalorder %s606_s19, %s876_s6 }
 0x13e   : > { %p608_p1 = pnand %p607_p9, %p803_p10 }
 0x13f   : > { %p613_p4 = por %p612_p3, %p611_p7 }
 0x140   : > { %p609_p2 = pneg %p608_p1 }
 0x141   : > { %p615_p6 = por %p614_p13, %p613_p4 }
 0x143   : > { %p616_p8 = pnand %p615_p6, %p609_p2 }
 0x145   : > { %619 = shalt.err (!%p616_p8)
}
 0x146   : > { %461 = dma.vmem_to_hbm [thread:$0]  (%p803_p10), %s878_s11, 128, %s876_s6, %s307_s26  }
 0x147 PF: > { %s333_s9 = sand.u32 1, %s658_s12   ;;  %p946_p12 = scmp.ne.s32.totalorder %s936_s23, 0 }
 0x148   : > { %p947_p11 = scmp.ge.s32.totalorder %s678_s17, 2  ;;  %s334_s20 = scalar_lea.sflag [#allocation4], %s333_s9 }
 0x14a   : > { %p472_p0 = pnand %p947_p11, %p946_p12 }
 0x14c   : > { %653 = dma.done.wait (!%p472_p0), %s334_s20, 128  }
 0x14d   : > { %655 = vsyncadd (!%p472_p0), %s334_s20, 4294967168  ;;  %s20_s17 = sadd.s32 1, %s678_s17   ;;  %s948_s12 = smov %s662_s13 }
 0x14e   : > { %p17_p5 = scmp.ge.s32.totalorder %s20_s17, 4   ;;  %s949_s13 = smov %s666_s14 }
 0x14f   : > { %s950_s14 = smov %s812_s5  ;;  %s951_s15 = smov %s674_s16 }
 0x150   : > { %s952_s16 = smov %s954_s28  ;;  %19 = sbr.rel (!%p17_p5) target bundleno = 7 (0x7), region = 85 }
 0x157   :  { %339 = vsyncpa [#allocation3], 1 }
 0x158   :  { %341 = vsyncpa [#allocation3 + $0x1], 1 }
 0x159   :  { %342 = vsyncpa [#allocation6], 1 }
 0x15a   :  { %343 = vsyncpa [#allocation4], 1 }
 0x15b   :  { %345 = vsyncpa [#allocation4 + $0x1], 1 }

</bundles_post_ra>
